<compile_context>
chip_gen: v7x
topology: tpu7x:2x2x1
jax: 0.10.0
libtpu: 0.0.40
codegen_flags: <defaults>
</compile_context>

<pallas_src>
import jax
import jax.numpy as jnp
from jax.experimental import pallas as pl
from jax.experimental.pallas import tpu as pltpu

_LANE = 128          # lane width: the stored output dim is padded to this
_SUBLANE = 8         # f32 sublane granularity for the batch (row) axis
_HIDDEN_PAD = 16     # bf16 sublane multiple: enough for never-stored internal dims
_MAX_BATCH_TILE = 1024   # rows per grid step (v6e sweet spot; clamped by VMEM below)
_MIN_GRID_STEPS = 2      # keep both v7x TensorCores busy when the batch allows


def _round_up(v, m):
    return (v + m - 1) // m * m


def _pad2(a, rows, cols):
    pr, pc = rows - a.shape[0], cols - a.shape[1]
    if pr or pc:
        a = jnp.pad(a, ((0, pr), (0, pc)))
    return a


def _mlp_kernel(x_ref,
                w1_ref, b1_ref,
                w2_ref, b2_ref,
                w3_ref, b3_ref,
                w4_ref, b4_ref,
                o_ref):
    # bf16 operands into the MXU, f32 accumulation / bias-add / ReLU (VPU).
    mm = lambda a, w: jnp.dot(a.astype(w.dtype), w,
                              preferred_element_type=jnp.float32)
    x = x_ref[...]
    h = mm(x, w1_ref[...]) + b1_ref[...]      # hidden  (no activation)
    h = mm(h, w2_ref[...]) + b2_ref[...]      # hidden1 (no activation)
    h = mm(h, w3_ref[...]) + b3_ref[...]      # hidden2
    h = jnp.maximum(h, 0.0)                   # relu (f32, VPU)
    y = mm(h, w4_ref[...]) + b4_ref[...]      # predict
    o_ref[...] = y.astype(o_ref.dtype)


def _resident_spec(shape):
    """Constant-index, VMEM-resident, single-buffered block (params never change)."""
    try:
        return pl.BlockSpec(shape, lambda i: (0, 0), pipeline_mode=pl.Buffered(1))
    except TypeError:
        # older JAX without pipeline_mode kwarg: fall back to default buffering
        return pl.BlockSpec(shape, lambda i: (0, 0))


def net_forward(x, params):
    """params = ((w1,b1),(w2,b2),(w3,b3),(w4,b4)); w_i is (in,out), b_i is (1,out)."""
    (w1, b1), (w2, b2), (w3, b3), (w4, b4) = params
    batch, n_feature = x.shape
    n_output = w4.shape[1]

    # --- padded dims -------------------------------------------------------
    # Internal (contraction / never-stored) dims: bf16 sublane multiple only.
    # Stored output dim: full 128-lane density -> unmasked vst on writeback.
    F = _round_up(n_feature, _HIDDEN_PAD)
    H1 = _round_up(w1.shape[1], _HIDDEN_PAD)
    H2 = _round_up(w2.shape[1], _HIDDEN_PAD)
    H3 = _round_up(w3.shape[1], _HIDDEN_PAD)
    O = _round_up(n_output, _LANE)

    # --- VMEM budget -------------------------------------------------------
    # Single-buffered resident parameters (bf16 weights, f32 biases).
    param_bytes = (F * H1 + H1 * H2 + H2 * H3 + H3 * O) * 2 \
                  + (H1 + H2 + H3 + O) * 4
    try:
        vmem_cap = int(pltpu.get_tpu_info().vmem_capacity_bytes)
    except Exception:
        vmem_cap = 64 * 1024 * 1024   # conservative (v7x per-TC VMEM)

    # TODO(synk): if param_bytes exceeds ~70% of vmem_cap (large hidden dims on
    # v7x's 64 MiB), switch the two largest layers to an N-tiled weight-streaming
    # grid axis instead of full residency.

    # --- batch tiling (parallel grid axis) ----------------------------------
    B_r = _round_up(batch, _SUBLANE)
    tb = min(_MAX_BATCH_TILE, B_r)
    if B_r >= _MIN_GRID_STEPS * _SUBLANE:
        # ensure >= _MIN_GRID_STEPS grid steps so v7x can shard across both TCs
        tb = min(tb, _round_up(pl.cdiv(B_r, _MIN_GRID_STEPS), _SUBLANE))
    tb = max(tb, _SUBLANE)

    def _act_bytes(t):
        # 2x bf16 input tiles + 2x f32 output tiles (double-buffered pipeline)
        # + a few live f32 intermediate slabs inside the kernel (generous).
        return (2 * t * F * 2
                + 2 * t * O * 4
                + 4 * t * max(H1, H2, H3, O) * 4)

    budget = int(0.8 * vmem_cap)
    while tb > _SUBLANE and param_bytes + _act_bytes(tb) > budget:
        tb = max(_SUBLANE, _round_up(tb // 2, _SUBLANE))

    B = _round_up(batch, tb)
    grid = (B // tb,)

    vmem_limit = int(1.25 * (param_bytes + _act_bytes(tb)))
    vmem_limit = max(vmem_limit, 32 * 1024 * 1024)
    vmem_limit = min(vmem_limit, int(0.9 * vmem_cap))

    # --- pad + cast at the boundary ------------------------------------------
    # Activations & weights -> bf16 (MXU operands, half the DMA bytes).
    # Biases stay f32 (added after the f32 accumulation).
    xp = _pad2(x, B, F).astype(jnp.bfloat16)
    w1p = _pad2(w1, F, H1).astype(jnp.bfloat16)
    w2p = _pad2(w2, H1, H2).astype(jnp.bfloat16)
    w3p = _pad2(w3, H2, H3).astype(jnp.bfloat16)
    w4p = _pad2(w4, H3, O).astype(jnp.bfloat16)
    b1p = _pad2(b1, 1, H1)
    b2p = _pad2(b2, 1, H2)
    b3p = _pad2(b3, 1, H3)
    b4p = _pad2(b4, 1, O)

    flops = 2 * B * (F * H1 + H1 * H2 + H2 * H3 + H3 * O)
    bytes_accessed = (xp.size * 2
                      + sum(w.size * 2 for w in (w1p, w2p, w3p, w4p))
                      + sum(b.size * 4 for b in (b1p, b2p, b3p, b4p))
                      + B * O * 4)

    out = pl.pallas_call(
        _mlp_kernel,
        out_shape=jax.ShapeDtypeStruct((B, O), jnp.float32),
        grid=grid,
        in_specs=[pl.BlockSpec((tb, F), lambda i: (i, 0)),
                  _resident_spec(w1p.shape), _resident_spec(b1p.shape),
                  _resident_spec(w2p.shape), _resident_spec(b2p.shape),
                  _resident_spec(w3p.shape), _resident_spec(b3p.shape),
                  _resident_spec(w4p.shape), _resident_spec(b4p.shape)],
        out_specs=pl.BlockSpec((tb, O), lambda i: (i, 0)),
        compiler_params=pltpu.CompilerParams(
            dimension_semantics=("parallel",),
            vmem_limit_bytes=vmem_limit),
        cost_estimate=pl.CostEstimate(flops=flops,
                                      transcendentals=0,
                                      bytes_accessed=bytes_accessed),
    )(xp, w1p, b1p, w2p, b2p, w3p, b3p, w4p, b4p)

    # strip batch / lane padding
    return out[:batch, :n_output]


def init_params(key, n_feature, n_hidden, n_hidden1, n_hidden2, n_output):
    """Deterministic torch-nn.Linear-style init (uniform(-1/sqrt(in), 1/sqrt(in)))."""
    dims = [(n_feature, n_hidden),
            (n_hidden, n_hidden1),
            (n_hidden1, n_hidden2),
            (n_hidden2, n_output)]
    params = []
    for (fan_in, fan_out) in dims:
        key, kw, kb = jax.random.split(key, 3)
        bound = 1.0 / (fan_in ** 0.5)
        w = jax.random.uniform(kw, (fan_in, fan_out), jnp.float32, -bound, bound)
        b = jax.random.uniform(kb, (1, fan_out), jnp.float32, -bound, bound)
        params.append((w, b))
    return params


def reference_forward(x, params, matmul_dtype=jnp.float32):
    (w1, b1), (w2, b2), (w3, b3), (w4, b4) = params

    def lin(a, w, b):
        return jnp.dot(a.astype(matmul_dtype), w.astype(matmul_dtype),
                       preferred_element_type=jnp.float32) + b

    h = lin(x, w1, b1)
    h = lin(h, w2, b2)
    h = jnp.maximum(lin(h, w3, b3), 0.0)
    return lin(h, w4, b4)


if __name__ == "__main__":
    # small shapes consistent with the module's forward
    batch, n_feature, n_hidden, n_hidden1, n_hidden2, n_output = 8, 32, 64, 64, 64, 16

    key = jax.random.PRNGKey(0)
    key, kx = jax.random.split(key)
    x = jax.random.normal(kx, (batch, n_feature), jnp.float32)

    params = init_params(key, n_feature, n_hidden, n_hidden1, n_hidden2, n_output)

    out = jax.block_until_ready(net_forward(x, params))

    # precision-matched reference (bf16 matmul operands, f32 accumulation)
    ref_matched = reference_forward(x, params, matmul_dtype=jnp.bfloat16)
    # pure-f32 reference: loose semantics sanity check
    ref_f32 = reference_forward(x, params, matmul_dtype=jnp.float32)

    assert out.shape == (batch, n_output)
    assert jnp.allclose(out, ref_matched, atol=2e-3, rtol=2e-3)
    assert jnp.allclose(out, ref_f32, atol=2e-1, rtol=2e-1)

    print("KERNEL_OK")
</pallas_src>

<mosaic_0001>
module attributes {stable_mosaic.version = 11 : i64} {
  func.func @_mlp_kernel(%arg0: i32, %arg1: memref<8x32xbf16, #tpu.memory_space<vmem>>, %arg2: memref<32x64xbf16, #tpu.memory_space<vmem>>, %arg3: memref<1x64xf32, #tpu.memory_space<vmem>>, %arg4: memref<64x64xbf16, #tpu.memory_space<vmem>>, %arg5: memref<1x64xf32, #tpu.memory_space<vmem>>, %arg6: memref<64x64xbf16, #tpu.memory_space<vmem>>, %arg7: memref<1x64xf32, #tpu.memory_space<vmem>>, %arg8: memref<64x128xbf16, #tpu.memory_space<vmem>>, %arg9: memref<1x128xf32, #tpu.memory_space<vmem>>, %arg10: memref<8x128xf32, #tpu.memory_space<vmem>>) attributes {dimension_semantics = [#tpu.dimension_semantics<parallel>], iteration_bounds = array<i64: 1>, scalar_prefetch = 0 : i64, scratch_operands = 0 : i64, tpu.core_type = #tpu.core_type<tc>, window_params = [{transform_indices = @transform_0, window_bounds = array<i64: 8, 32>}, {pipeline_mode = #tpu.pipeline_mode<synchronous>, transform_indices = @transform_1, window_bounds = array<i64: 32, 64>}, {pipeline_mode = #tpu.pipeline_mode<synchronous>, transform_indices = @transform_2, window_bounds = array<i64: 1, 64>}, {pipeline_mode = #tpu.pipeline_mode<synchronous>, transform_indices = @transform_3, window_bounds = array<i64: 64, 64>}, {pipeline_mode = #tpu.pipeline_mode<synchronous>, transform_indices = @transform_4, window_bounds = array<i64: 1, 64>}, {pipeline_mode = #tpu.pipeline_mode<synchronous>, transform_indices = @transform_5, window_bounds = array<i64: 64, 64>}, {pipeline_mode = #tpu.pipeline_mode<synchronous>, transform_indices = @transform_6, window_bounds = array<i64: 1, 64>}, {pipeline_mode = #tpu.pipeline_mode<synchronous>, transform_indices = @transform_7, window_bounds = array<i64: 64, 128>}, {pipeline_mode = #tpu.pipeline_mode<synchronous>, transform_indices = @transform_8, window_bounds = array<i64: 1, 128>}, {transform_indices = @transform_9, window_bounds = array<i64: 8, 128>}]} {
    %c0 = arith.constant 0 : index
    %c0_0 = arith.constant 0 : index
    %0 = vector.load %arg1[%c0, %c0_0] : memref<8x32xbf16, #tpu.memory_space<vmem>>, vector<8x32xbf16>
    %c0_1 = arith.constant 0 : index
    %c0_2 = arith.constant 0 : index
    %1 = vector.load %arg2[%c0_1, %c0_2] : memref<32x64xbf16, #tpu.memory_space<vmem>>, vector<32x64xbf16>
    %cst = arith.constant dense<0.000000e+00> : vector<8x64xf32>
    %2 = tpu.matmul %0, %1, %cst {dimension_numbers = #tpu.dot_dimension_numbers<[1], [0], [0], [1], [0, 0, 1, 1], [], []>} : vector<8x32xbf16>, vector<32x64xbf16>, vector<8x64xf32> -> vector<8x64xf32>
    %c0_3 = arith.constant 0 : index
    %c0_4 = arith.constant 0 : index
    %3 = vector.load %arg3[%c0_3, %c0_4] : memref<1x64xf32, #tpu.memory_space<vmem>>, vector<1x64xf32>
    %4 = vector.broadcast %3 : vector<1x64xf32> to vector<8x64xf32>
    %5 = arith.addf %2, %4 : vector<8x64xf32>
    %c0_5 = arith.constant 0 : index
    %c0_6 = arith.constant 0 : index
    %6 = vector.load %arg4[%c0_5, %c0_6] : memref<64x64xbf16, #tpu.memory_space<vmem>>, vector<64x64xbf16>
    %7 = arith.truncf %5 : vector<8x64xf32> to vector<8x64xbf16>
    %cst_7 = arith.constant dense<0.000000e+00> : vector<8x64xf32>
    %8 = tpu.matmul %7, %6, %cst_7 {dimension_numbers = #tpu.dot_dimension_numbers<[1], [0], [0], [1], [0, 0, 1, 1], [], []>} : vector<8x64xbf16>, vector<64x64xbf16>, vector<8x64xf32> -> vector<8x64xf32>
    %c0_8 = arith.constant 0 : index
    %c0_9 = arith.constant 0 : index
    %9 = vector.load %arg5[%c0_8, %c0_9] : memref<1x64xf32, #tpu.memory_space<vmem>>, vector<1x64xf32>
    %10 = vector.broadcast %9 : vector<1x64xf32> to vector<8x64xf32>
    %11 = arith.addf %8, %10 : vector<8x64xf32>
    %c0_10 = arith.constant 0 : index
    %c0_11 = arith.constant 0 : index
    %12 = vector.load %arg6[%c0_10, %c0_11] : memref<64x64xbf16, #tpu.memory_space<vmem>>, vector<64x64xbf16>
    %13 = arith.truncf %11 : vector<8x64xf32> to vector<8x64xbf16>
    %cst_12 = arith.constant dense<0.000000e+00> : vector<8x64xf32>
    %14 = tpu.matmul %13, %12, %cst_12 {dimension_numbers = #tpu.dot_dimension_numbers<[1], [0], [0], [1], [0, 0, 1, 1], [], []>} : vector<8x64xbf16>, vector<64x64xbf16>, vector<8x64xf32> -> vector<8x64xf32>
    %c0_13 = arith.constant 0 : index
    %c0_14 = arith.constant 0 : index
    %15 = vector.load %arg7[%c0_13, %c0_14] : memref<1x64xf32, #tpu.memory_space<vmem>>, vector<1x64xf32>
    %16 = vector.broadcast %15 : vector<1x64xf32> to vector<8x64xf32>
    %17 = arith.addf %14, %16 : vector<8x64xf32>
    %cst_15 = arith.constant 0.000000e+00 : f32
    %18 = vector.broadcast %cst_15 : f32 to vector<8x64xf32>
    %19 = arith.maximumf %17, %18 : vector<8x64xf32>
    %c0_16 = arith.constant 0 : index
    %c0_17 = arith.constant 0 : index
    %20 = vector.load %arg8[%c0_16, %c0_17] : memref<64x128xbf16, #tpu.memory_space<vmem>>, vector<64x128xbf16>
    %21 = arith.truncf %19 : vector<8x64xf32> to vector<8x64xbf16>
    %cst_18 = arith.constant dense<0.000000e+00> : vector<8x128xf32>
    %22 = tpu.matmul %21, %20, %cst_18 {dimension_numbers = #tpu.dot_dimension_numbers<[1], [0], [0], [1], [0, 0, 1, 1], [], []>} : vector<8x64xbf16>, vector<64x128xbf16>, vector<8x128xf32> -> vector<8x128xf32>
    %c0_19 = arith.constant 0 : index
    %c0_20 = arith.constant 0 : index
    %23 = vector.load %arg9[%c0_19, %c0_20] : memref<1x128xf32, #tpu.memory_space<vmem>>, vector<1x128xf32>
    %24 = vector.broadcast %23 : vector<1x128xf32> to vector<8x128xf32>
    %25 = arith.addf %22, %24 : vector<8x128xf32>
    %c0_21 = arith.constant 0 : index
    %c0_22 = arith.constant 0 : index
    %26 = vector.load %arg10[%c0_21, %c0_22] : memref<8x128xf32, #tpu.memory_space<vmem>>, vector<8x128xf32>
    tpu.vector_store %arg10[%c0_21, %c0_22], %25 {strides = array<i32>} : memref<8x128xf32, #tpu.memory_space<vmem>>, vector<8x128xf32>,
    return
  }
  func.func @transform_0(%arg0: i32) -> (i32, i32) {
    %c0_i32 = arith.constant 0 : i32
    %c0_i32_0 = arith.constant 0 : i32
    return %arg0, %c0_i32 : i32, i32
  }
  func.func @transform_1(%arg0: i32) -> (i32, i32) {
    %c0_i32 = arith.constant 0 : i32
    %c0_i32_0 = arith.constant 0 : i32
    %c0_i32_1 = arith.constant 0 : i32
    return %c0_i32, %c0_i32_0 : i32, i32
  }
  func.func @transform_2(%arg0: i32) -> (i32, i32) {
    %c0_i32 = arith.constant 0 : i32
    %c0_i32_0 = arith.constant 0 : i32
    %c0_i32_1 = arith.constant 0 : i32
    return %c0_i32, %c0_i32_0 : i32, i32
  }
  func.func @transform_3(%arg0: i32) -> (i32, i32) {
    %c0_i32 = arith.constant 0 : i32
    %c0_i32_0 = arith.constant 0 : i32
    %c0_i32_1 = arith.constant 0 : i32
    return %c0_i32, %c0_i32_0 : i32, i32
  }
  func.func @transform_4(%arg0: i32) -> (i32, i32) {
    %c0_i32 = arith.constant 0 : i32
    %c0_i32_0 = arith.constant 0 : i32
    %c0_i32_1 = arith.constant 0 : i32
    return %c0_i32, %c0_i32_0 : i32, i32
  }
  func.func @transform_5(%arg0: i32) -> (i32, i32) {
    %c0_i32 = arith.constant 0 : i32
    %c0_i32_0 = arith.constant 0 : i32
    %c0_i32_1 = arith.constant 0 : i32
    return %c0_i32, %c0_i32_0 : i32, i32
  }
  func.func @transform_6(%arg0: i32) -> (i32, i32) {
    %c0_i32 = arith.constant 0 : i32
    %c0_i32_0 = arith.constant 0 : i32
    %c0_i32_1 = arith.constant 0 : i32
    return %c0_i32, %c0_i32_0 : i32, i32
  }
  func.func @transform_7(%arg0: i32) -> (i32, i32) {
    %c0_i32 = arith.constant 0 : i32
    %c0_i32_0 = arith.constant 0 : i32
    %c0_i32_1 = arith.constant 0 : i32
    return %c0_i32, %c0_i32_0 : i32, i32
  }
  func.func @transform_8(%arg0: i32) -> (i32, i32) {
    %c0_i32 = arith.constant 0 : i32
    %c0_i32_0 = arith.constant 0 : i32
    %c0_i32_1 = arith.constant 0 : i32
    return %c0_i32, %c0_i32_0 : i32, i32
  }
  func.func @transform_9(%arg0: i32) -> (i32, i32) {
    %c0_i32 = arith.constant 0 : i32
    %c0_i32_0 = arith.constant 0 : i32
    return %arg0, %c0_i32 : i32, i32
  }
}

</mosaic_0001>

<bundles_post_ra>
// kernel: tpu_custom_call.1
= control target key start
LH: loop header
LB: loop body
LE: loop exit
PB: predicated region body
PF: predicated region fallthrough
CT: control target
= control target key end

     0   :  { %14 = vsyncpa [#allocation3], 0  ;;  %s866_s0 = inlined_call_operand.hbm [shape: bf16[8,32], index: 0, kind: input, shape index: {}]   ;;  %s867_s1 = inlined_call_operand.hbm [shape: bf16[32,64], index: 1, kind: input, shape index: {}]   ;;  %s868_s2 = inlined_call_operand.vmem [shape: f32[1,64], index: 2, kind: input, shape index: {}]   ;;  %s869_s3 = inlined_call_operand.hbm [shape: bf16[64,64], index: 3, kind: input, shape index: {}]   ;;  %s870_s4 = inlined_call_operand.vmem [shape: f32[1,64], index: 4, kind: input, shape index: {}]   ;;  %s871_s5 = inlined_call_operand.hbm [shape: bf16[64,64], index: 5, kind: input, shape index: {}]   ;;  %s872_s6 = inlined_call_operand.vmem [shape: f32[1,64], index: 6, kind: input, shape index: {}]   ;;  %s873_s7 = inlined_call_operand.hbm [shape: bf16[64,128], index: 7, kind: input, shape index: {}]   ;;  %s874_s8 = inlined_call_operand.vmem [shape: f32[1,128], index: 8, kind: input, shape index: {}]   ;;  %s875_s9 = inlined_call_operand.hbm [shape: f32[8,128], index: 9, kind: output, shape index: {}]  }
   0x1   :  { %15 = vsyncpa [#allocation6], 0 }
   0x2   :  { %16 = vsyncpa [#allocation9], 0 }
   0x3   :  { %17 = vsyncpa [#allocation4], 0  ;;  %s685_s30 = smov [#allocation5]   ;;  %s545_s13 = scalar_lea.hbm %s867_s1, 256 }
   0x4   :  { %s33_s10 = sshll.u32 %s685_s30, 4  ;;  %p546_p0 = scmp.ne.s32.totalorder %s867_s1, %s545_s13  ;;  %s34_s10 = int_to_ptr.vmem [resolvable:$true] %s33_s10 }
   0x5   :  { %p549_p1 = scmp.lt.u32.totalorder %s545_s13, %s867_s1 }
   0x7   :  { %p551_p2 = pnand %p549_p1, %p546_p0 }
   0x9   :  { %554 = shalt.err (!%p551_p2)
}
   0xa   :  { %s555_s18 = scalar_lea.vmem %s34_s10, 256  ;;  %p560_p4 = scmp.lt.s32.totalorder %s34_s10, %s34_s10 }
   0xb   :  { %p556_p3 = scmp.ne.s32.totalorder %s34_s10, %s555_s18  ;;  %p561_p5 = scmp.lt.s32.totalorder %s555_s18, %s555_s18 }
   0xd   :  { %p562_p6 = por %p561_p5, %p560_p4 }
   0xf   :  { %p563_p7 = pnand %p562_p6, %p556_p3 }
  0x11   :  { %566 = shalt.err (!%p563_p7)
}
  0x12   :  { %s686_s19 = smov 64   ;;  %s687_s20 = smov 4  }
  0x13   :  { %39 = dma.hbm_to_vmem [thread:$0]  %s867_s1, 256, %s34_s10, [#allocation6], %s686_s19, %s686_s19, %s687_s20  }
  0x14   :  { %s688_s23 = smov [#allocation8]   ;;  %s689_s25 = smov [#allocation2]  }
  0x15   :  { %s61_s24 = sshll.u32 %s688_s23, 4  ;;  %s24_s26 = sshll.u32 %s689_s25, 4  ;;  %s62_s24 = int_to_ptr.vmem [resolvable:$true] %s61_s24  ;;  %s25_s26 = int_to_ptr.vmem [resolvable:$true] %s24_s26 }
  0x16   :  { %s567_s29 = scalar_lea.hbm %s871_s5, 512 }
  0x17   :  { %p568_p8 = scmp.ne.s32.totalorder %s871_s5, %s567_s29  ;;  %p571_p9 = scmp.lt.u32.totalorder %s567_s29, %s871_s5 }
  0x19   :  { %p573_p10 = pnand %p571_p9, %p568_p8 }
  0x1b   :  { %576 = shalt.err (!%p573_p10)
}
  0x1c   :  { %s577_s1 = scalar_lea.vmem %s62_s24, 512  ;;  %p582_p12 = scmp.lt.s32.totalorder %s62_s24, %s62_s24 }
  0x1d   :  { %p578_p11 = scmp.ne.s32.totalorder %s62_s24, %s577_s1  ;;  %p583_p13 = scmp.lt.s32.totalorder %s577_s1, %s577_s1 }
  0x1f   :  { %p584_p0 = por %p583_p13, %p582_p12 }
  0x21   :  { %p585_p1 = pnand %p584_p0, %p578_p11 }
  0x23   :  { %588 = shalt.err (!%p585_p1)
}
  0x24   :  { %67 = dma.hbm_to_vmem [thread:$0]  %s871_s5, 512, %s62_s24, [#allocation9], %s686_s19, %s686_s19, %s687_s20  }
  0x25   :  { %s589_s17 = scalar_lea.hbm %s866_s0, 64 }
  0x26   :  { %p590_p2 = scmp.ne.s32.totalorder %s866_s0, %s589_s17  ;;  %p593_p3 = scmp.lt.u32.totalorder %s589_s17, %s866_s0 }
  0x28   :  { %p595_p4 = pnand %p593_p3, %p590_p2 }
  0x2a   :  { %598 = shalt.err (!%p595_p4)
}
  0x2b   :  { %s599_s25 = scalar_lea.vmem %s25_s26, 64  ;;  %p604_p6 = scmp.lt.s32.totalorder %s25_s26, %s25_s26 }
  0x2c   :  { %p600_p5 = scmp.ne.s32.totalorder %s25_s26, %s599_s25  ;;  %p605_p7 = scmp.lt.s32.totalorder %s599_s25, %s599_s25 }
  0x2e   :  { %p606_p8 = por %p605_p7, %p604_p6 }
  0x30   :  { %p607_p9 = pnand %p606_p8, %p600_p5 }
  0x32   :  { %610 = shalt.err (!%p607_p9)
}
  0x33   :  { %27 = dma.hbm_to_vmem [thread:$0]  %s866_s0, 64, %s25_s26, [#allocation3]  }
  0x34   :  { %s690_s27 = smov [#allocation7]   ;;  %s691_s29 = smov [#allocation10]  }
  0x35   :  { %s47_s28 = sshll.u32 %s690_s27, 4  ;;  %s75_s30 = sshll.u32 %s691_s29, 4  ;;  %s48_s28 = int_to_ptr.vmem [resolvable:$true] %s47_s28  ;;  %s76_s30 = int_to_ptr.vmem [resolvable:$true] %s75_s30 }
  0x36   :  { %s611_s13 = scalar_lea.hbm %s869_s3, 512 }
  0x37   :  { %p612_p10 = scmp.ne.s32.totalorder %s869_s3, %s611_s13  ;;  %p615_p11 = scmp.lt.u32.totalorder %s611_s13, %s869_s3 }
  0x39   :  { %p617_p12 = pnand %p615_p11, %p612_p10 }
  0x3b   :  { %620 = shalt.err (!%p617_p12)
}
  0x3c   :  { %s621_s0 = scalar_lea.vmem %s48_s28, 512  ;;  %p626_p0 = scmp.lt.s32.totalorder %s48_s28, %s48_s28 }
  0x3d   :  { %p622_p13 = scmp.ne.s32.totalorder %s48_s28, %s621_s0  ;;  %p627_p1 = scmp.lt.s32.totalorder %s621_s0, %s621_s0 }
  0x3f   :  { %p628_p2 = por %p627_p1, %p626_p0 }
  0x41   :  { %p629_p3 = pnand %p628_p2, %p622_p13 }
  0x43   :  { %632 = shalt.err (!%p629_p3)
}
  0x44   :  { %53 = dma.hbm_to_vmem [thread:$0]  %s869_s3, 512, %s48_s28, [#allocation6], %s686_s19, %s686_s19, %s687_s20  }
  0x45   :  { %s633_s21 = scalar_lea.hbm %s873_s7, 512 }
  0x46   :  { %p634_p4 = scmp.ne.s32.totalorder %s873_s7, %s633_s21  ;;  %p637_p5 = scmp.lt.u32.totalorder %s633_s21, %s873_s7 }
  0x48   :  { %p639_p6 = pnand %p637_p5, %p634_p4 }
  0x4a   :  { %642 = shalt.err (!%p639_p6)
}
  0x4b   :  { %s643_s24 = scalar_lea.vmem %s76_s30, 512  ;;  %p648_p8 = scmp.lt.s32.totalorder %s76_s30, %s76_s30 }
  0x4c   :  { %p644_p7 = scmp.ne.s32.totalorder %s76_s30, %s643_s24  ;;  %p649_p9 = scmp.lt.s32.totalorder %s643_s24, %s643_s24 }
  0x4e   :  { %p650_p10 = por %p649_p9, %p648_p8 }
  0x50   :  { %p651_p11 = pnand %p650_p10, %p644_p7 }
  0x52   :  { %654 = shalt.err (!%p651_p11)
}
  0x53   :  { %81 = dma.hbm_to_vmem [thread:$0]  %s873_s7, 512, %s76_s30, [#allocation9], %s686_s19, %s686_s19, %s687_s20  }
  0x54   :  { %677 = dma.done.wait [#allocation3], 64  }
  0x55   :  { %678 = vsyncadd [#allocation3], 4294967232 }
  0x56   :  { %679 = dma.done.wait [#allocation6], 768  }
  0x57   :  { %680 = vsyncadd [#allocation6], 4294966528 }
  0x58   :  { %681 = dma.done.wait [#allocation9], 1024  }
  0x59   :  { %682 = vsyncadd [#allocation9], 4294966272  ;;  %v692_v0 = vmov 0.0   ;;  %vm693_vm0 = vmmov 0   ;;  %v531_v1 = vld [vmem:[#allocation5] sm:$0xff]   ;;  %v532_v2 = vld [vmem:[#allocation5 + $0x8] sm:$0xff]  }
  0x5a   :  { %477 = vmatprep.subr.bf16.mxu0 %v692_v0  ;;  %481 = vmatprep.mubr.msk.bf16.mxu0 %vm693_vm0, %v692_v0  ;;  %v533_v3 = vld [vmem:[#allocation7] sm:$0xff]   ;;  %v100_v4 = vld [vmem:[#allocation2] sm:$0xf]  ;;  %vm124_vm1 = vcmask 261120   ;;  %v535_v6 = vld [vmem:[#allocation7 + $0x10] sm:$0xff]   ;;  %vm208_vm2 = vcmask 523264  }
  0x5b   :  { %485 = vmatprep.subr.bf16.mxu1 %v692_v0  ;;  %493 = vmatprep.mubr.msk.bf16.mxu1 %vm693_vm0, %v692_v0  ;;  %v534_v5 = vld [vmem:[#allocation7 + $0x8] sm:$0xff]   ;;  %v536_v7 = vld [vmem:[#allocation7 + $0x18] sm:$0xff]   ;;  %v537_v8 = vld [vmem:[#allocation8] sm:$0xff]   ;;  %s694_s11 = smov [#allocation11]  }
  0x5c   :  { %478 = vmatpush3.bf16.msra.mxu0 %v531_v1  ;;  %486 = vmatpush3.bf16.msra.mxu1 %v533_v3  ;;  %v538_v9 = vld [vmem:[#allocation8 + $0x8] sm:$0xff]   ;;  %v539_v10 = vld [vmem:[#allocation8 + $0x10] sm:$0xff]   ;;  %v540_v18 = vld [vmem:[#allocation8 + $0x18] sm:$0xff]   ;;  %s426_s12 = sshll.u32 %s694_s11, 4  ;;  %s427_s12 = int_to_ptr.vmem [resolvable:$true] %s426_s12 }
  0x5d   :  { %479 = vmatprep.subr.bf16.mxu0 %v692_v0  ;;  %487 = vmatprep.subr.bf16.mxu1 %v692_v0  ;;  %v437_v11 = vld [vmem:[%s868_s2] ss:$0 sm:$0xff]  ;;  %v541_v19 = vld [vmem:[#allocation10] sm:$0xff]   ;;  %v543_v28 = vld [vmem:[#allocation10 + $0x10] sm:$0xff]   ;;  %p660_p13 = scmp.lt.s32.totalorder %s427_s12, %s427_s12 }
  0x5e   :  { %v542_v20 = vld [vmem:[#allocation10 + $0x8] sm:$0xff]   ;;  %v544_v29 = vld [vmem:[#allocation10 + $0x18] sm:$0xff]  }
  0x5f   :  { %v441_v21 = vld [vmem:[%s870_s4] ss:$0 sm:$0xff] }
  0x60   :  { %480 = vmatpush3.bf16.msra.mxu0 %v532_v2  ;;  %488 = vmatpush3.bf16.msra.mxu1 %v534_v5  ;;  %v447_v30 = vld [vmem:[%s872_s6] ss:$0 sm:$0xff]  ;;  %s655_s6 = scalar_lea.vmem %s427_s12, 128 }
  0x61   :  { %497 = vmatprep.subr.bf16.mxu0 %v692_v0  ;;  %489 = vmatprep.subr.bf16.mxu1 %v692_v0  ;;  %v453_v38 = vld [vmem:[%s874_s8] ss:$0 sm:$0xff]  ;;  %p656_p12 = scmp.ne.s32.totalorder %s427_s12, %s655_s6  ;;  %p661_p0 = scmp.lt.s32.totalorder %s655_s6, %s655_s6 }
  0x63   :  { %482 = vmatmul.mubr.msk.bf16.vlgmr.msra.gmra.mrb[0].mxu0 %vm124_vm1, %v100_v4  ;;  %p662_p1 = por %p661_p0, %p660_p13 }
  0x64   :  { %505 = vmatprep.mubr.msk.bf16.mxu0 %vm693_vm0, %v692_v0  ;;  %490 = vmatpush3.bf16.msra.mxu1 %v535_v6 }
  0x65   :  { %491 = vmatprep.subr.bf16.mxu1 %v692_v0  ;;  %498 = vmatpush3.bf16.msra.mxu0 %v537_v8  ;;  %p663_p2 = pnand %p662_p1, %p656_p12 }
  0x66   :  { %499 = vmatprep.subr.bf16.mxu0 %v692_v0 }
  0x68   :  { %492 = vmatpush3.bf16.msra.mxu1 %v536_v7 }
  0x69   :  { %509 = vmatprep.subr.bf16.mxu1 %v692_v0  ;;  %500 = vmatpush3.bf16.msra.mxu0 %v538_v9 }
  0x6a   :  { %501 = vmatprep.subr.bf16.mxu0 %v692_v0 }
  0x6d   :  { %502 = vmatpush3.bf16.msra.mxu0 %v539_v10 }
  0x6e   :  { %503 = vmatprep.subr.bf16.mxu0 %v692_v0 }
  0x71   :  { %504 = vmatpush3.bf16.msra.mxu0 %v540_v18 }
 0x136   :  { %v162_v12 = vpop.f32.mrb[0].mxu0 }
 0x137   :  { %v163_v13 = vadd.f32 %v437_v11, %v162_v12  ;;  %v483_v14 = vpop.f32.mrb[1].mxu0 }
 0x138   :  { %v165_v15 = vpop.f32.mrb[2].mxu0 }
 0x139   :  { %v176_v16 = vpack.c.bf16 %v163_v13, %v163_v13  ;;  %v484_v17 = vpop.f32.mrb[3].mxu0 }
 0x13b   :  { %494 = vmatmul.mubr.msk.bf16.vlgmr.msra.gmra.mrb[0].mxu1 %vm208_vm2, %v176_v16 }
 0x13c   :  { %517 = vmatprep.mubr.msk.bf16.mxu1 %vm693_vm0, %v692_v0  ;;  %510 = vmatpush3.bf16.msra.mxu1 %v541_v19 }
 0x13d   :  { %511 = vmatprep.subr.bf16.mxu1 %v692_v0 }
 0x140   :  { %512 = vmatpush3.bf16.msra.mxu1 %v542_v20 }
 0x141   :  { %513 = vmatprep.subr.bf16.mxu1 %v692_v0 }
 0x144   :  { %514 = vmatpush3.bf16.msra.mxu1 %v543_v28 }
 0x145   :  { %515 = vmatprep.subr.bf16.mxu1 %v692_v0 }
 0x148   :  { %516 = vmatpush3.bf16.msra.mxu1 %v544_v29 }
 0x20e   :  { %v246_v22 = vpop.f32.mrb[0].mxu1 }
 0x20f   :  { %v247_v23 = vadd.f32 %v441_v21, %v246_v22  ;;  %v495_v24 = vpop.f32.mrb[1].mxu1 }
 0x210   :  { %v249_v25 = vpop.f32.mrb[2].mxu1 }
 0x211   :  { %v260_v26 = vpack.c.bf16 %v247_v23, %v247_v23  ;;  %v496_v27 = vpop.f32.mrb[3].mxu1 }
 0x213   :  { %506 = vmatmul.mubr.msk.bf16.vlgmr.msra.gmra.mrb[4].mxu0 %vm208_vm2, %v260_v26 }
 0x2e6   :  { %v329_v31 = vpop.f32.mrb[4].mxu0 }
 0x2e7   :  { %v330_v32 = vadd.f32 %v447_v30, %v329_v31  ;;  %v507_v33 = vpop.f32.mrb[5].mxu0 }
 0x2e8   :  { %v332_v34 = vpop.f32.mrb[6].mxu0 }
 0x2e9   :  { %v335_v35 = vmax.f32 %v330_v32, 0.0  ;;  %v508_v36 = vpop.f32.mrb[7].mxu0 }
 0x2eb   :  { %v344_v37 = vpack.c.bf16 %v335_v35, %v335_v35 }
 0x2ed   :  { %518 = vmatmul.mubr.msk.bf16.vlgmr.msra.gmra.mrb[4].mxu1 %vm208_vm2, %v344_v37 }
 0x3c0   :  { %v413_v39 = vpop.f32.mrb[4].mxu1 }
 0x3c1   :  { %v414_v40 = vadd.f32 %v453_v38, %v413_v39  ;;  %v519_v41 = vpop.f32.mrb[5].mxu1 }
 0x3c2   :  { %v416_v42 = vpop.f32.mrb[6].mxu1 }
 0x3c3   :  { %419 = vst [vmem:[#allocation11] sm:$0xff] %v414_v40  ;;  %v520_v43 = vpop.f32.mrb[7].mxu1 }
 0x3c4   :  { %666 = shalt.err (!%p663_p2)
}
 0x3c5   :  { %s667_s8 = scalar_lea.hbm %s875_s9, 128 }
 0x3c6   :  { %p668_p3 = scmp.ne.s32.totalorder %s875_s9, %s667_s8  ;;  %p671_p4 = scmp.lt.u32.totalorder %s667_s8, %s875_s9 }
 0x3c8   :  { %p673_p5 = pnand %p671_p4, %p668_p3 }
 0x3ca   :  { %676 = shalt.err (!%p673_p5)
}
 0x3cb   :  { %429 = dma.vmem_to_hbm [thread:$0]  %s427_s12, 128, %s875_s9, [#allocation4]  }
 0x3cc   :  { %683 = dma.done.wait [#allocation4], 128  }
 0x3cd   :  { %684 = vsyncadd [#allocation4], 4294967168 }
 0x3ce   :  { %433 = vsyncpa [#allocation3], 1 }
 0x3cf   :  { %434 = vsyncpa [#allocation6], 1 }
 0x3d0   :  { %435 = vsyncpa [#allocation9], 1 }
 0x3d1   :  { %436 = vsyncpa [#allocation4], 1 }

</bundles_post_ra>
